<compile_context>
chip_gen: v6e
topology: v6e:2x2x1
jax: 0.10.0
libtpu: 0.0.40
codegen_flags: <defaults>
</compile_context>

<pallas_src>
import math
import numpy as np

import jax
import jax.numpy as jnp
from jax.experimental import pallas as pl
from jax.experimental.pallas import tpu as pltpu


# ------------------------------ helpers ------------------------------------ #

def _round_up(x, m):
    return -(-x // m) * m


def _pad_to(a, shape):
    pads = [(0, t - s) for s, t in zip(a.shape, shape)]
    if any(p[1] > 0 for p in pads):
        return jnp.pad(a, pads)
    return a


def _pick_row_tile(dim, cap=512):
    """Sublane (second-to-last) tile for a dim that is a multiple of 8.
    Returns (tile, padded_dim); prefers a divisor >= 128 to avoid padding."""
    if dim <= cap:
        return dim, dim
    for t in range(cap, 127, -8):
        if dim % t == 0:
            return t, dim
    return cap, _round_up(dim, cap)


def _pick_lane_tile(dim, cap=512):
    """Lane (last-dim) tile: full dim if small, else largest of 512/256/128
    that divides it (dim is always padded to a multiple of 128 beforehand)."""
    if dim <= cap:
        return dim
    for t in (512, 256, 128):
        if dim % t == 0:
            return t
    return 128


def _vmem_budget_bytes():
    """Generation-aware VMEM budget (~48 MiB on v7x, ~96 MiB on v5e/v6e)."""
    cap = 64 * 1024 * 1024  # conservative default if the query fails
    try:
        info = pltpu.get_tpu_info()
        cap = int(getattr(info, "vmem_capacity_bytes", cap))
    except Exception:
        pass
    return max(32 * 1024 * 1024, min(cap * 3 // 4, 100 * 1024 * 1024))


# ------------------------------ kernels ------------------------------------ #

def _make_mm_fullk_kernel(has_bias):
    """o = x @ W (+ bias); whole reduction dim in one block (no K grid axis)."""
    def kernel(*refs):
        if has_bias:
            x_ref, w_ref, b_ref, o_ref = refs
        else:
            x_ref, w_ref, o_ref = refs
            b_ref = None
        acc = jnp.dot(x_ref[...], w_ref[...], preferred_element_type=jnp.float32)
        if has_bias:
            acc = acc + b_ref[...].astype(jnp.float32)
        o_ref[...] = acc.astype(o_ref.dtype)
    return kernel


def _make_mm_ktiled_kernel(has_bias, direct):
    """o = x @ W (+ bias); reduction streamed over grid axis 2.
    direct=True accumulates straight into the (f32) output block."""
    def kernel(*refs):
        if has_bias:
            x_ref, w_ref, b_ref = refs[:3]
            rest = refs[3:]
        else:
            x_ref, w_ref = refs[:2]
            b_ref = None
            rest = refs[2:]
        o_ref = rest[0]
        acc_ref = o_ref if direct else rest[1]
        k = pl.program_id(2)

        @pl.when(k == 0)
        def _():
            acc_ref[...] = jnp.zeros_like(acc_ref)

        acc_ref[...] += jnp.dot(x_ref[...], w_ref[...],
                                preferred_element_type=jnp.float32)

        if has_bias or not direct:
            @pl.when(k == pl.num_programs(2) - 1)
            def _():
                res = acc_ref[...]
                if has_bias:
                    res = res + b_ref[...].astype(jnp.float32)
                o_ref[...] = res.astype(o_ref.dtype)
    return kernel


def _make_adj_band_kernel(tk, has_bias, direct):
    """out[b, i-tile] = sum_k adj_band[i-tile, k-tile] @ y[b, k-tile] (+ bias).
    adj row band (tn, N_pad) is VMEM-resident; the k-tile is sliced in-kernel."""
    def kernel(*refs):
        if has_bias:
            adj_ref, y_ref, b_ref = refs[:3]
            rest = refs[3:]
        else:
            adj_ref, y_ref = refs[:2]
            b_ref = None
            rest = refs[2:]
        o_ref = rest[0]
        acc_ref = o_ref if direct else rest[1]
        k = pl.program_id(3)

        @pl.when(k == 0)
        def _():
            acc_ref[...] = jnp.zeros_like(acc_ref)

        koff = pl.multiple_of(k * tk, tk)
        acc_ref[...] += jnp.dot(adj_ref[:, pl.ds(koff, tk)], y_ref[...],
                                preferred_element_type=jnp.float32)

        if has_bias or not direct:
            @pl.when(k == pl.num_programs(3) - 1)
            def _():
                res = acc_ref[...]
                if has_bias:
                    res = res + b_ref[...].astype(jnp.float32)
                o_ref[...] = res.astype(o_ref.dtype)
    return kernel


def _make_adj_stream_kernel(has_bias, direct):
    """Fallback: out[b, i, j] = sum_k adj[i, k] @ y[b, k, j] with streamed adj."""
    def kernel(*refs):
        if has_bias:
            adj_ref, y_ref, b_ref = refs[:3]
            rest = refs[3:]
        else:
            adj_ref, y_ref = refs[:2]
            b_ref = None
            rest = refs[2:]
        o_ref = rest[0]
        acc_ref = o_ref if direct else rest[1]
        k = pl.program_id(3)

        @pl.when(k == 0)
        def _():
            acc_ref[...] = jnp.zeros_like(acc_ref)

        acc_ref[...] += jnp.dot(adj_ref[...], y_ref[...],
                                preferred_element_type=jnp.float32)

        if has_bias or not direct:
            @pl.when(k == pl.num_programs(3) - 1)
            def _():
                res = acc_ref[...]
                if has_bias:
                    res = res + b_ref[...].astype(jnp.float32)
                o_ref[...] = res.astype(o_ref.dtype)
    return kernel


# ------------------------------ stage wrappers ------------------------------ #

def _feature_transform(x2d, w, bias_row, out_dtype, budget):
    """(M, K) @ (K, F) [+ bias] -> (M, F).  K, F are multiples of 128."""
    M, K = x2d.shape
    _, F = w.shape
    ib = x2d.dtype.itemsize
    ob = np.dtype(out_dtype).itemsize

    tm, mp = _pick_row_tile(M, cap=512)
    if mp != M:
        x2d = _pad_to(x2d, (mp, K))
    tf = _pick_lane_tile(F, cap=512)

    has_bias = bias_row is not None
    direct = np.dtype(out_dtype) == np.float32
    margin = budget - (4 << 20)
    bias_args = [bias_row] if has_bias else []

    # Preferred path: full-K blocks (W resident per column tile, no K grid axis,
    # no accumulator).  x is read from HBM exactly once.
    fullk_bytes = 2 * (tm * K + K * tf + tf) * ib + 2 * tm * tf * ob
    if fullk_bytes <= margin:
        in_specs = [pl.BlockSpec((tm, K), lambda i, j: (i, 0)),
                    pl.BlockSpec((K, tf), lambda i, j: (0, j))]
        if has_bias:
            in_specs.append(pl.BlockSpec((1, tf), lambda i, j: (0, j)))
        out = pl.pallas_call(
            _make_mm_fullk_kernel(has_bias),
            out_shape=jax.ShapeDtypeStruct((mp, F), out_dtype),
            grid_spec=pltpu.PrefetchScalarGridSpec(
                num_scalar_prefetch=0,
                grid=(mp // tm, F // tf),
                in_specs=in_specs,
                out_specs=pl.BlockSpec((tm, tf), lambda i, j: (i, j))),
            compiler_params=pltpu.CompilerParams(
                dimension_semantics=("parallel", "parallel"),
                vmem_limit_bytes=budget),
        )(x2d, w, *bias_args)
    else:
        # Fallback for very large Fin: stream K in tiles, accumulate over axis 2.
        tk = _pick_lane_tile(K, cap=512)
        in_specs = [pl.BlockSpec((tm, tk), lambda i, j, k: (i, k)),
                    pl.BlockSpec((tk, tf), lambda i, j, k: (k, j))]
        if has_bias:
            in_specs.append(pl.BlockSpec((1, tf), lambda i, j, k: (0, j)))
        scratch = [] if direct else [pltpu.VMEM((tm, tf), jnp.float32)]
        out = pl.pallas_call(
            _make_mm_ktiled_kernel(has_bias, direct),
            out_shape=jax.ShapeDtypeStruct((mp, F), out_dtype),
            grid_spec=pltpu.PrefetchScalarGridSpec(
                num_scalar_prefetch=0,
                grid=(mp // tm, F // tf, K // tk),
                in_specs=in_specs,
                out_specs=pl.BlockSpec((tm, tf), lambda i, j, k: (i, j)),
                scratch_shapes=scratch),
            compiler_params=pltpu.CompilerParams(
                dimension_semantics=("parallel", "parallel", "arbitrary"),
                vmem_limit_bytes=budget),
        )(x2d, w, *bias_args)

    return out[:M] if mp != M else out


def _adj_aggregate(adj_p, y, bias_row, out_dtype, budget):
    """out[b] = adj_p @ y[b] [+ bias].  adj_p (Np, Np), y (B, Np, F), F % 128 == 0."""
    B, np_, F = y.shape
    ib = y.dtype.itemsize
    ob = np.dtype(out_dtype).itemsize

    tf = _pick_lane_tile(F, cap=512)
    has_bias = bias_row is not None
    direct = np.dtype(out_dtype) == np.float32
    margin = budget - (4 << 20)
    bias_args = [bias_row] if has_bias else []

    # Node-dim tile candidates (largest first), all dividing np_.
    if np_ <= 512:
        tn_cands = [np_]
    else:
        tn_cands = [t for t in (512, 256, 128) if np_ % t == 0]

    # Preferred path: VMEM-resident adjacency row band -> adj read from HBM once.
    tn_band = None
    for tn in tn_cands:
        footprint = (2 * tn * np_ * ib        # adj row band (double buffered)
                     + 2 * tn * tf * ib       # y k-tile
                     + 2 * tn * tf * ob       # output tile
                     + (0 if direct else tn * tf * 4)
                     + 2 * tf * ib)           # bias row
        if footprint <= margin:
            tn_band = tn
            break

    if tn_band is not None:
        tn = tn_band
        tk = tn
        in_specs = [pl.BlockSpec((tn, np_), lambda i, j, b, k: (i, 0)),
                    pl.BlockSpec((None, tk, tf), lambda i, j, b, k: (b, k, j))]
        if has_bias:
            in_specs.append(pl.BlockSpec((1, tf), lambda i, j, b, k: (0, j)))
        scratch = [] if direct else [pltpu.VMEM((tn, tf), jnp.float32)]
        return pl.pallas_call(
            _make_adj_band_kernel(tk, has_bias, direct),
            out_shape=jax.ShapeDtypeStruct((B, np_, F), out_dtype),
            grid_spec=pltpu.PrefetchScalarGridSpec(
                num_scalar_prefetch=0,
                grid=(np_ // tn, F // tf, B, np_ // tk),
                in_specs=in_specs,
                out_specs=pl.BlockSpec((None, tn, tf),
                                       lambda i, j, b, k: (b, i, j)),
                scratch_shapes=scratch),
            compiler_params=pltpu.CompilerParams(
                dimension_semantics=("parallel", "parallel", "parallel",
                                     "arbitrary"),
                vmem_limit_bytes=budget),
        )(adj_p, y, *bias_args)

    # Fallback for very large N: stream adj in (tn, tn) tiles.
    tn = tn_cands[0]
    in_specs = [pl.BlockSpec((tn, tn), lambda b, i, j, k: (i, k)),
                pl.BlockSpec((None, tn, tf), lambda b, i, j, k: (b, k, j))]
    if has_bias:
        in_specs.append(pl.BlockSpec((1, tf), lambda b, i, j, k: (0, j)))
    scratch = [] if direct else [pltpu.VMEM((tn, tf), jnp.float32)]
    return pl.pallas_call(
        _make_adj_stream_kernel(has_bias, direct),
        out_shape=jax.ShapeDtypeStruct((B, np_, F), out_dtype),
        grid_spec=pltpu.PrefetchScalarGridSpec(
            num_scalar_prefetch=0,
            grid=(B, np_ // tn, F // tf, np_ // tn),
            in_specs=in_specs,
            out_specs=pl.BlockSpec((None, tn, tf), lambda b, i, j, k: (b, i, j)),
            scratch_shapes=scratch),
        compiler_params=pltpu.CompilerParams(
            dimension_semantics=("parallel", "parallel", "parallel", "arbitrary"),
            vmem_limit_bytes=budget),
    )(adj_p, y, *bias_args)


# ------------------------------ public API ---------------------------------- #

def graph_convolution(x, adj, weight, bias=None, *, compute_dtype=None):
    """Pallas GCN layer: adj @ (x @ weight) (+ bias).

    x: [B, N, Fin], adj: [N, N], weight: [Fin, Fout], bias: [1, 1, Fout] | None.
    Returns [B, N, Fout] in x.dtype.
    compute_dtype: optionally cast operands (e.g. jnp.bfloat16 — recommended on
    v5e/v6e/v7x for bandwidth + MXU rate); accumulation stays float32, but the
    inter-stage intermediate is stored in compute_dtype (one extra rounding).
    """
    B, N, Fin = x.shape
    Fin_w, Fout = weight.shape
    assert Fin_w == Fin, "weight shape mismatch"
    out_dtype = x.dtype
    cdt = np.dtype(x.dtype if compute_dtype is None else compute_dtype)

    budget = _vmem_budget_bytes()

    # Node padding: multiple of 8 when small (single tile), else 128 (tiles are
    # chosen from divisors) -> minimal wasted adj traffic / flops.
    np_pad = _round_up(N, 8) if N <= 512 else _round_up(N, 128)
    fin_p = _round_up(Fin, 128)
    fout_p = _round_up(Fout, 128)

    xp = _pad_to(x.astype(cdt), (B, np_pad, fin_p))
    adj_p = _pad_to(adj.astype(cdt), (np_pad, np_pad))
    wp = _pad_to(weight.astype(cdt), (fin_p, fout_p))
    bias_row = None
    if bias is not None:
        bias_row = _pad_to(bias.reshape(1, -1).astype(cdt), (1, fout_p))

    if Fout <= Fin:
        # Shrink features first: out = adj @ (x @ W)  (+ bias in stage 2).
        support = _feature_transform(xp.reshape(B * np_pad, fin_p), wp, None,
                                     cdt, budget)
        support = support.reshape(B, np_pad, fout_p)
        out_p = _adj_aggregate(adj_p, support, bias_row, out_dtype, budget)
    else:
        # Aggregate first (fewer N^2 flops): out = (adj @ x) @ W  (+ bias).
        hidden = _adj_aggregate(adj_p, xp, None, cdt, budget)
        out2d = _feature_transform(hidden.reshape(B * np_pad, fin_p), wp,
                                   bias_row, out_dtype, budget)
        out_p = out2d.reshape(B, np_pad, fout_p)

    return out_p[:, :N, :Fout]


def init_gcn_params(key, in_features, out_features, bias=False, dtype=jnp.float32):
    # Matches reset_parameters(): uniform(-stdv, stdv), stdv = 1/sqrt(out_features)
    stdv = 1.0 / math.sqrt(out_features)
    kw, kb = jax.random.split(key)
    weight = jax.random.uniform(
        kw, (in_features, out_features), dtype=dtype, minval=-stdv, maxval=stdv)
    b = None
    if bias:
        b = jax.random.uniform(
            kb, (1, 1, out_features), dtype=dtype, minval=-stdv, maxval=stdv)
    return weight, b


if __name__ == "__main__":
    key = jax.random.PRNGKey(0)
    k_x, k_adj, k_p, k_x2, k_adj2, k_p2 = jax.random.split(key, 6)

    # --- Test 1: module defaults (bias=False), Fout <= Fin (transform-first). ---
    B, N, Fin, Fout = 2, 8, 32, 32
    x = jax.random.normal(k_x, (B, N, Fin), dtype=jnp.float32)
    adj = jax.random.uniform(k_adj, (N, N), dtype=jnp.float32)
    weight, bias = init_gcn_params(k_p, Fin, Fout, bias=False)

    out = jax.block_until_ready(graph_convolution(x, adj, weight, bias))
    ref = jnp.matmul(adj, jnp.matmul(x, weight))
    assert out.shape == (B, N, Fout)
    assert jnp.allclose(out, ref, atol=1e-5, rtol=1e-5)

    # --- Test 2: bias=True, Fin < Fout (aggregate-first order swap). ---
    B2, N2, Fin2, Fout2 = 2, 8, 16, 64
    x2 = jax.random.normal(k_x2, (B2, N2, Fin2), dtype=jnp.float32)
    adj2 = jax.random.uniform(k_adj2, (N2, N2), dtype=jnp.float32)
    w2, b2 = init_gcn_params(k_p2, Fin2, Fout2, bias=True)

    out2 = jax.block_until_ready(graph_convolution(x2, adj2, w2, b2))
    ref2 = jnp.matmul(adj2, jnp.matmul(x2, w2)) + b2
    assert out2.shape == (B2, N2, Fout2)
    assert jnp.allclose(out2, ref2, atol=1e-4, rtol=1e-4)

    # --- Test 3: padding + resident adj-band path with N not 128-aligned. ---
    B3, N3, Fin3, Fout3 = 2, 300, 96, 160
    kx3, ka3, kp3 = jax.random.split(jax.random.PRNGKey(1), 3)
    x3 = jax.random.normal(kx3, (B3, N3, Fin3), dtype=jnp.float32)
    adj3 = jax.random.uniform(ka3, (N3, N3), dtype=jnp.float32)
    w3, _ = init_gcn_params(kp3, Fin3, Fout3, bias=False)

    out3 = jax.block_until_ready(graph_convolution(x3, adj3, w3, None))
    ref3 = jnp.matmul(adj3, jnp.matmul(x3, w3))
    assert out3.shape == (B3, N3, Fout3)
    assert jnp.allclose(out3, ref3, atol=1e-3, rtol=1e-3)

    # --- Test 4: bf16 operand compute (f32 accumulation), loose tolerance. ---
    out4 = jax.block_until_ready(
        graph_convolution(x3, adj3, w3, None, compute_dtype=jnp.bfloat16))
    assert out4.shape == (B3, N3, Fout3)
    assert jnp.allclose(out4, ref3, atol=0.5, rtol=5e-2)

    print("KERNEL_OK")
</pallas_src>

<mosaic_0001>
module attributes {stable_mosaic.version = 11 : i64} {
  func.func @kernel(%arg0: i32, %arg1: i32, %arg2: memref<16x128xf32, #tpu.memory_space<vmem>>, %arg3: memref<128x128xf32, #tpu.memory_space<vmem>>, %arg4: memref<16x128xf32, #tpu.memory_space<vmem>>) attributes {dimension_semantics = [#tpu.dimension_semantics<parallel>, #tpu.dimension_semantics<parallel>], iteration_bounds = array<i64: 1, 1>, scalar_prefetch = 0 : i64, scratch_operands = 0 : i64, tpu.core_type = #tpu.core_type<tc>, window_params = [{transform_indices = @transform_0, window_bounds = array<i64: 16, 128>}, {transform_indices = @transform_1, window_bounds = array<i64: 128, 128>}, {transform_indices = @transform_2, window_bounds = array<i64: 16, 128>}]} {
    %c0 = arith.constant 0 : index
    %c0_0 = arith.constant 0 : index
    %0 = vector.load %arg2[%c0, %c0_0] : memref<16x128xf32, #tpu.memory_space<vmem>>, vector<16x128xf32>
    %c0_1 = arith.constant 0 : index
    %c0_2 = arith.constant 0 : index
    %1 = vector.load %arg3[%c0_1, %c0_2] : memref<128x128xf32, #tpu.memory_space<vmem>>, vector<128x128xf32>
    %cst = arith.constant dense<0.000000e+00> : vector<16x128xf32>
    %2 = tpu.matmul %0, %1, %cst {dimension_numbers = #tpu.dot_dimension_numbers<[1], [0], [0], [1], [0, 0, 1, 1], [], []>} : vector<16x128xf32>, vector<128x128xf32>, vector<16x128xf32> -> vector<16x128xf32>
    %c0_3 = arith.constant 0 : index
    %c0_4 = arith.constant 0 : index
    %3 = vector.load %arg4[%c0_3, %c0_4] : memref<16x128xf32, #tpu.memory_space<vmem>>, vector<16x128xf32>
    tpu.vector_store %arg4[%c0_3, %c0_4], %2 {strides = array<i32>} : memref<16x128xf32, #tpu.memory_space<vmem>>, vector<16x128xf32>,
    return
  }
  func.func @transform_0(%arg0: i32, %arg1: i32) -> (i32, i32) {
    %c0_i32 = arith.constant 0 : i32
    %c0_i32_0 = arith.constant 0 : i32
    return %arg0, %c0_i32 : i32, i32
  }
  func.func @transform_1(%arg0: i32, %arg1: i32) -> (i32, i32) {
    %c0_i32 = arith.constant 0 : i32
    %c0_i32_0 = arith.constant 0 : i32
    return %c0_i32, %arg1 : i32, i32
  }
  func.func @transform_2(%arg0: i32, %arg1: i32) -> (i32, i32) {
    %c0_i32 = arith.constant 0 : i32
    return %arg0, %arg1 : i32, i32
  }
}

</mosaic_0001>

<bundles_post_ra>
// kernel: tpu_custom_call.1
= control target key start
LH: loop header
LB: loop body
LE: loop exit
PB: predicated region body
PF: predicated region fallthrough
CT: control target
= control target key end

     0   :  { %7 = vsyncpa [#allocation3], 0  ;;  %s315_s0 = inlined_call_operand.hbm [shape: f32[16,128], index: 0, kind: input, shape index: {}]   ;;  %s316_s1 = inlined_call_operand.hbm [shape: f32[128,128], index: 1, kind: input, shape index: {}]   ;;  %s317_s2 = inlined_call_operand.hbm [shape: f32[16,128], index: 2, kind: output, shape index: {}]  }
   0x1   :  { %8 = vsyncpa [#allocation6], 0 }
   0x2   :  { %9 = vsyncpa [#allocation4], 0  ;;  %s277_s9 = smov [#allocation2]  }
   0x3   :  { %s15_s10 = sshll.u32 %s277_s9, 4  ;;  %s16_s10 = int_to_ptr.vmem [resolvable:$true] %s15_s10 }
   0x4   :  { %s219_s11 = scalar_lea.vmem %s16_s10, 256  ;;  %p224_p1 = scmp.lt.s32.totalorder %s16_s10, %s16_s10 }
   0x5   :  { %p220_p0 = scmp.ne.s32.totalorder %s16_s10, %s219_s11  ;;  %p225_p2 = scmp.lt.s32.totalorder %s219_s11, %s219_s11 }
   0x7   :  { %p226_p3 = por %p225_p2, %p224_p1 }
   0x9   :  { %p227_p4 = pnand %p226_p3, %p220_p0 }
   0xb   :  { %230 = shalt.err (!%p227_p4)
}
   0xc   :  { %s278_s12 = smov 128   ;;  %s279_s13 = smov 8  }
   0xd   :  { %21 = dma.hbm_to_vmem [thread:$0]  %s315_s0, 256, %s16_s10, [#allocation3], %s278_s12, %s278_s12, %s279_s13  }
   0xe   :  { %s280_s16 = smov [#allocation5]  }
   0xf   :  { %s27_s17 = sshll.u32 %s280_s16, 4  ;;  %s28_s17 = int_to_ptr.vmem [resolvable:$true] %s27_s17 }
  0x10   :  { %s239_s18 = scalar_lea.vmem %s28_s17, 2048  ;;  %p244_p6 = scmp.lt.s32.totalorder %s28_s17, %s28_s17 }
  0x11   :  { %p240_p5 = scmp.ne.s32.totalorder %s28_s17, %s239_s18  ;;  %p245_p7 = scmp.lt.s32.totalorder %s239_s18, %s239_s18 }
  0x13   :  { %p246_p8 = por %p245_p7, %p244_p6 }
  0x15   :  { %p247_p9 = pnand %p246_p8, %p240_p5 }
  0x17   :  { %250 = shalt.err (!%p247_p9)
}
  0x18   :  { %33 = dma.hbm_to_vmem [thread:$0]  %s316_s1, 2048, %s28_s17, [#allocation6], %s278_s12, %s278_s12, %s279_s13  }
  0x19   :  { %271 = dma.done.wait [#allocation3], 256  }
  0x1a   :  { %272 = vsyncadd [#allocation3], 4294967040 }
  0x1b   :  { %273 = dma.done.wait [#allocation6], 2048  }
  0x1c   :  { %274 = vsyncadd [#allocation6], 4294965248  ;;  %v57_v0 = vld [vmem:[#allocation5 + $0x78] sm:$0xff]  ;;  %v56_v1 = vld [vmem:[#allocation5 + $0x70] sm:$0xff]  ;;  %s281_s0 = smov [#allocation7]  }
  0x1d   :  { %171 = vmatprep.subr.mxu0 %v57_v0  ;;  %v55_v2 = vld [vmem:[#allocation5 + $0x68] sm:$0xff]  ;;  %v54_v3 = vld [vmem:[#allocation5 + $0x60] sm:$0xff]  ;;  %v40_v4 = vld [vmem:[#allocation2] sm:$0xff]  ;;  %s140_s1 = sshll.u32 %s281_s0, 4  ;;  %s141_s1 = int_to_ptr.vmem [resolvable:$true] %s140_s1 }
  0x1e   :  { %172 = vmatpush3.msra.mxu0 %v57_v0  ;;  %v53_v5 = vld [vmem:[#allocation5 + $0x58] sm:$0xff]  ;;  %203 = vmatprep.mubr.f32.mxu0 %v40_v4  ;;  %v52_v6 = vld [vmem:[#allocation5 + $0x50] sm:$0xff]  ;;  %v51_v7 = vld [vmem:[#allocation5 + $0x48] sm:$0xff]  ;;  %s251_s21 = scalar_lea.vmem %s141_s1, 256  ;;  %p256_p11 = scmp.lt.s32.totalorder %s141_s1, %s141_s1 }
  0x1f   :  { %173 = vmatprep.subr.mxu0 %v56_v1  ;;  %v50_v8 = vld [vmem:[#allocation5 + $0x40] sm:$0xff]  ;;  %v49_v9 = vld [vmem:[#allocation5 + $0x38] sm:$0xff]  ;;  %v48_v10 = vld [vmem:[#allocation5 + $0x30] sm:$0xff]  ;;  %p252_p10 = scmp.ne.s32.totalorder %s141_s1, %s251_s21  ;;  %p257_p12 = scmp.lt.s32.totalorder %s251_s21, %s251_s21 }
  0x20   :  { %174 = vmatpush3.msra.mxu0 %v56_v1  ;;  %v47_v11 = vld [vmem:[#allocation5 + $0x28] sm:$0xff]  ;;  %v46_v12 = vld [vmem:[#allocation5 + $0x20] sm:$0xff]  ;;  %v45_v13 = vld [vmem:[#allocation5 + $0x18] sm:$0xff] }
  0x21   :  { %175 = vmatprep.subr.mxu0 %v55_v2  ;;  %v44_v14 = vld [vmem:[#allocation5 + $0x10] sm:$0xff]  ;;  %v43_v15 = vld [vmem:[#allocation5 + $0x8] sm:$0xff]  ;;  %v42_v16 = vld [vmem:[#allocation5] sm:$0xff]  ;;  %p258_p13 = por %p257_p12, %p256_p11 }
  0x22   :  { %176 = vmatpush3.msra.mxu0 %v55_v2  ;;  %v41_v17 = vld [vmem:[#allocation2 + $0x8] sm:$0xff] }
  0x23   :  { %177 = vmatprep.subr.mxu0 %v54_v3  ;;  %p259_p0 = pnand %p258_p13, %p252_p10 }
  0x24   :  { %178 = vmatpush3.msra.mxu0 %v54_v3 }
  0x25   :  { %179 = vmatprep.subr.mxu0 %v53_v5 }
  0x26   :  { %180 = vmatpush3.msra.mxu0 %v53_v5 }
  0x27   :  { %181 = vmatprep.subr.mxu0 %v52_v6 }
  0x28   :  { %182 = vmatpush3.msra.mxu0 %v52_v6 }
  0x29   :  { %183 = vmatprep.subr.mxu0 %v51_v7 }
  0x2a   :  { %184 = vmatpush3.msra.mxu0 %v51_v7 }
  0x2b   :  { %185 = vmatprep.subr.mxu0 %v50_v8 }
  0x2c   :  { %186 = vmatpush3.msra.mxu0 %v50_v8 }
  0x2d   :  { %187 = vmatprep.subr.mxu0 %v49_v9 }
  0x2e   :  { %188 = vmatpush3.msra.mxu0 %v49_v9 }
  0x2f   :  { %189 = vmatprep.subr.mxu0 %v48_v10 }
  0x30   :  { %190 = vmatpush3.msra.mxu0 %v48_v10 }
  0x31   :  { %191 = vmatprep.subr.mxu0 %v47_v11 }
  0x32   :  { %192 = vmatpush3.msra.mxu0 %v47_v11 }
  0x33   :  { %193 = vmatprep.subr.mxu0 %v46_v12 }
  0x34   :  { %194 = vmatpush3.msra.mxu0 %v46_v12 }
  0x35   :  { %195 = vmatprep.subr.mxu0 %v45_v13 }
  0x36   :  { %196 = vmatpush3.msra.mxu0 %v45_v13 }
  0x37   :  { %197 = vmatprep.subr.mxu0 %v44_v14 }
  0x38   :  { %198 = vmatpush3.msra.mxu0 %v44_v14 }
  0x39   :  { %199 = vmatprep.subr.mxu0 %v43_v15 }
  0x3a   :  { %200 = vmatpush3.msra.mxu0 %v43_v15 }
  0x3b   :  { %201 = vmatprep.subr.mxu0 %v42_v16 }
  0x3c   :  { %202 = vmatpush3.msra.mxu0 %v42_v16 }
  0x3d   :  { %204 = vmatmul.mubr.f32.vlgmr.msra.gmra.mxu0 %v41_v17 }
  0xfd   :  { %v205_v18 = vpop.f32.mrf.mxu0 }
  0xfe   :  { %134 = vst [vmem:[#allocation7 + $0x8] sm:$0xff] %v205_v18 }
  0xff   :  { %v124_v19 = vpop.f32.mrf.mxu0 }
 0x100   :  { %133 = vst [vmem:[#allocation7] sm:$0xff] %v124_v19 }
 0x101   :  { %262 = shalt.err (!%p259_p0)
}
 0x102   :  { %146 = dma.vmem_to_hbm [thread:$0]  %s141_s1, 256, %s317_s2, [#allocation4], %s278_s12, %s278_s12, %s279_s13  }
 0x103   :  { %275 = dma.done.wait [#allocation4], 256  }
 0x104   :  { %276 = vsyncadd [#allocation4], 4294967040 }
 0x105   :  { %150 = vsyncpa [#allocation3], 1 }
 0x106   :  { %151 = vsyncpa [#allocation6], 1 }
 0x107   :  { %152 = vsyncpa [#allocation4], 1 }

</bundles_post_ra>
